<compile_context>
chip_gen: v5e
topology: v5e:2x2
jax: 0.10.0
libtpu: 0.0.40
codegen_flags: <defaults>
</compile_context>

<pallas_src>
import functools

import jax
import jax.numpy as jnp
from jax.experimental import pallas as pl
from jax.experimental.pallas import tpu as pltpu

LANE = 128     # vreg lane width (last dim)
SUBLANE = 8    # vreg sublane count (second-last dim, f32)


def _round_up(n, m):
    return ((n + m - 1) // m) * m


def _cdiv(n, m):
    return (n + m - 1) // m


def qnet_kernel(x_ref, w1_ref, b1_ref, w2_ref, b2_ref, o_ref):
    # fc1 + ReLU: MXU matmul with f32 accumulate; bias-add / ReLU in f32 (VPU).
    h = jnp.dot(x_ref[...], w1_ref[...], preferred_element_type=jnp.float32)
    h = jnp.maximum(h + b1_ref[...], 0.0)                    # (TB,H) + (1,H)
    # fc2: straight to the true (TB, action_dim) output (masked vst, but
    # ~12x fewer HBM bytes than a 128-lane padded store + external slice).
    q = jnp.dot(h.astype(w2_ref.dtype), w2_ref[...],
                preferred_element_type=jnp.float32)
    o_ref[...] = (q + b2_ref[...]).astype(o_ref.dtype)       # (TB,A) + (1,A)


def prepare_params(w1, b1, w2, b2, *, dtype=jnp.float32):
    """One-time parameter prep (call at init / after each optimizer step).

    Weights are stored (in_features, out_features), i.e. torch weight.T.
    Pads hidden_dim up to a lane multiple (no-op for hidden_dim=128) and casts
    the streamed weights to `dtype` (f32 or bf16).  Biases stay f32: they are
    added after the f32 MXU accumulate.  Zero padding is numerically inert.
    """
    K, H = w1.shape
    A = w2.shape[1]
    H_p = _round_up(H, LANE)
    w1_p = jnp.pad(jnp.asarray(w1, dtype), ((0, 0), (0, H_p - H)))
    b1_p = jnp.pad(jnp.asarray(b1, jnp.float32).reshape(1, H),
                   ((0, 0), (0, H_p - H)))
    w2_p = jnp.pad(jnp.asarray(w2, dtype), ((0, H_p - H), (0, 0)))
    b2_p = jnp.asarray(b2, jnp.float32).reshape(1, A)
    return w1_p, b1_p, w2_p, b2_p


@functools.partial(jax.jit, static_argnames=("block_b",))
def qnet_forward(x, w1, b1, w2, b2, *, block_b=2048):
    """Q(s, .) = relu(x @ w1 + b1) @ w2 + b2.

    x: (B, state_dim).  w*/b*: outputs of prepare_params().  Returns
    (B, action_dim) float32 Q-values, identical math to the PyTorch module.
    """
    B, K = x.shape
    H_p = w1.shape[1]
    A = w2.shape[1]

    # Streamed input matches the stored weight dtype (no-op for f32).
    x = x.astype(w1.dtype)

    # Batch tile: tiny batches (action selection) take one exact step; larger
    # batches get >= 2 grid steps (v7x megacore split + DMA/compute overlap),
    # capped at block_b rows so big training batches stream through the grid.
    if B <= 64:
        TB = _round_up(B, SUBLANE)
    else:
        TB = min(_round_up(block_b, SUBLANE),
                 _round_up(_cdiv(B, 2), SUBLANE))
    grid = (_cdiv(B, TB),)   # ragged last block: padded reads, masked writes

    itemsize = lambda a: jnp.dtype(a.dtype).itemsize
    cost = pl.CostEstimate(
        flops=2 * B * (K * H_p + H_p * A),
        transcendentals=0,
        bytes_accessed=(x.size * itemsize(x) + w1.size * itemsize(w1)
                        + b1.size * 4 + w2.size * itemsize(w2) + b2.size * 4
                        + B * A * 4),
    )

    return pl.pallas_call(
        qnet_kernel,
        out_shape=jax.ShapeDtypeStruct((B, A), jnp.float32),
        grid=grid,
        in_specs=[
            # x: tiled along the batch grid axis; last dim == full array dim.
            pl.BlockSpec((TB, K), lambda i: (i, 0)),
            # Weights / biases: constant index_maps -> loaded once, resident
            # in VMEM across all grid steps (no per-step re-DMA).
            pl.BlockSpec((K, H_p), lambda i: (0, 0)),
            pl.BlockSpec((1, H_p), lambda i: (0, 0)),
            pl.BlockSpec((H_p, A), lambda i: (0, 0)),
            pl.BlockSpec((1, A), lambda i: (0, 0)),
        ],
        out_specs=pl.BlockSpec((TB, A), lambda i: (i, 0)),
        compiler_params=pltpu.CompilerParams(
            # Batch axis is embarrassingly parallel -> megacore split on v7x.
            dimension_semantics=("parallel",),
        ),
        cost_estimate=cost,
    )(x, w1, b1, w2, b2)


def init_params(key, state_dim, hidden_dim, action_dim):
    """Deterministic init mimicking torch.nn.Linear (uniform +/- 1/sqrt(fan_in)).

    Weights stored as (in_features, out_features), i.e. torch weight.T.
    """
    k1, k2, k3, k4 = jax.random.split(key, 4)
    bound1 = 1.0 / jnp.sqrt(state_dim)
    bound2 = 1.0 / jnp.sqrt(hidden_dim)
    w1 = jax.random.uniform(k1, (state_dim, hidden_dim), jnp.float32, -bound1, bound1)
    b1 = jax.random.uniform(k2, (1, hidden_dim), jnp.float32, -bound1, bound1)
    w2 = jax.random.uniform(k3, (hidden_dim, action_dim), jnp.float32, -bound2, bound2)
    b2 = jax.random.uniform(k4, (1, action_dim), jnp.float32, -bound2, bound2)
    return w1, b1, w2, b2


if __name__ == "__main__":
    # Pendulum-v1: state_dim = 3; module constants: hidden_dim = 128, action_dim = 11.
    state_dim, hidden_dim, action_dim = 3, 128, 11

    key = jax.random.PRNGKey(0)
    kx1, kx2, kx3, kp = jax.random.split(key, 4)
    w1, b1, w2, b2 = init_params(kp, state_dim, hidden_dim, action_dim)

    def ref_fwd(x):
        return jnp.maximum(x @ w1 + b1, 0.0) @ w2 + b2

    # f32 params, prepared once outside the hot path.
    p32 = prepare_params(w1, b1, w2, b2)

    # 1) Tiny action-selection-sized batch (single exact grid step).
    x_small = jax.random.normal(kx1, (8, state_dim), jnp.float32)
    out_small = jax.block_until_ready(qnet_forward(x_small, *p32))
    assert out_small.shape == (8, action_dim)
    assert jnp.allclose(out_small, ref_fwd(x_small), atol=1e-5, rtol=1e-5)

    # 2) Training-minibatch batch, not a multiple of the tile size
    #    (multi-step grid + masked ragged boundary block, no jnp.pad on x).
    x_mid = jax.random.normal(kx2, (260, state_dim), jnp.float32)
    out_mid = jax.block_until_ready(qnet_forward(x_mid, *p32, block_b=128))
    assert out_mid.shape == (260, action_dim)
    assert jnp.allclose(out_mid, ref_fwd(x_mid), atol=1e-5, rtol=1e-5)

    # 3) bf16-streamed variant (halved HBM traffic), larger batch -> exercises
    #    the guaranteed >= 2 grid steps path; output stays f32.
    p16 = prepare_params(w1, b1, w2, b2, dtype=jnp.bfloat16)
    x_big = jax.random.normal(kx3, (2048, state_dim), jnp.float32)
    out_big = jax.block_until_ready(qnet_forward(x_big, *p16))
    assert out_big.shape == (2048, action_dim)
    assert out_big.dtype == jnp.float32
    assert jnp.allclose(out_big, ref_fwd(x_big), atol=1e-1, rtol=5e-2)

    print("KERNEL_OK")
</pallas_src>

<mosaic_0001>
module attributes {stable_mosaic.version = 11 : i64} {
  func.func @qnet_kernel(%arg0: i32, %arg1: memref<8x3xf32, #tpu.memory_space<vmem>>, %arg2: memref<3x128xf32, #tpu.memory_space<vmem>>, %arg3: memref<1x128xf32, #tpu.memory_space<vmem>>, %arg4: memref<128x11xf32, #tpu.memory_space<vmem>>, %arg5: memref<1x11xf32, #tpu.memory_space<vmem>>, %arg6: memref<8x11xf32, #tpu.memory_space<vmem>>) attributes {dimension_semantics = [#tpu.dimension_semantics<parallel>], iteration_bounds = array<i64: 1>, scalar_prefetch = 0 : i64, scratch_operands = 0 : i64, tpu.core_type = #tpu.core_type<tc>, window_params = [{transform_indices = @transform_0, window_bounds = array<i64: 8, 3>}, {pipeline_mode = #tpu.pipeline_mode<synchronous>, transform_indices = @transform_1, window_bounds = array<i64: 3, 128>}, {pipeline_mode = #tpu.pipeline_mode<synchronous>, transform_indices = @transform_2, window_bounds = array<i64: 1, 128>}, {pipeline_mode = #tpu.pipeline_mode<synchronous>, transform_indices = @transform_3, window_bounds = array<i64: 128, 11>}, {pipeline_mode = #tpu.pipeline_mode<synchronous>, transform_indices = @transform_4, window_bounds = array<i64: 1, 11>}, {transform_indices = @transform_5, window_bounds = array<i64: 8, 11>}]} {
    %c0 = arith.constant 0 : index
    %c0_0 = arith.constant 0 : index
    %0 = vector.load %arg1[%c0, %c0_0] : memref<8x3xf32, #tpu.memory_space<vmem>>, vector<8x3xf32>
    %c0_1 = arith.constant 0 : index
    %c0_2 = arith.constant 0 : index
    %1 = vector.load %arg2[%c0_1, %c0_2] : memref<3x128xf32, #tpu.memory_space<vmem>>, vector<3x128xf32>
    %cst = arith.constant dense<0.000000e+00> : vector<8x128xf32>
    %2 = tpu.matmul %0, %1, %cst {dimension_numbers = #tpu.dot_dimension_numbers<[1], [0], [0], [1], [0, 0, 1, 1], [], []>} : vector<8x3xf32>, vector<3x128xf32>, vector<8x128xf32> -> vector<8x128xf32>
    %c0_3 = arith.constant 0 : index
    %c0_4 = arith.constant 0 : index
    %3 = vector.load %arg3[%c0_3, %c0_4] : memref<1x128xf32, #tpu.memory_space<vmem>>, vector<1x128xf32>
    %4 = vector.broadcast %3 : vector<1x128xf32> to vector<8x128xf32>
    %5 = arith.addf %2, %4 : vector<8x128xf32>
    %cst_5 = arith.constant 0.000000e+00 : f32
    %6 = vector.broadcast %cst_5 : f32 to vector<8x128xf32>
    %7 = arith.maximumf %5, %6 : vector<8x128xf32>
    %c0_6 = arith.constant 0 : index
    %c0_7 = arith.constant 0 : index
    %8 = vector.load %arg4[%c0_6, %c0_7] : memref<128x11xf32, #tpu.memory_space<vmem>>, vector<128x11xf32>
    %cst_8 = arith.constant dense<0.000000e+00> : vector<8x11xf32>
    %9 = tpu.matmul %7, %8, %cst_8 {dimension_numbers = #tpu.dot_dimension_numbers<[1], [0], [0], [1], [0, 0, 1, 1], [], []>} : vector<8x128xf32>, vector<128x11xf32>, vector<8x11xf32> -> vector<8x11xf32>
    %c0_9 = arith.constant 0 : index
    %c0_10 = arith.constant 0 : index
    %10 = vector.load %arg5[%c0_9, %c0_10] : memref<1x11xf32, #tpu.memory_space<vmem>>, vector<1x11xf32>
    %11 = vector.broadcast %10 : vector<1x11xf32> to vector<8x11xf32>
    %12 = arith.addf %9, %11 : vector<8x11xf32>
    %c0_11 = arith.constant 0 : index
    %c0_12 = arith.constant 0 : index
    %13 = vector.load %arg6[%c0_11, %c0_12] : memref<8x11xf32, #tpu.memory_space<vmem>>, vector<8x11xf32>
    tpu.vector_store %arg6[%c0_11, %c0_12], %12 {strides = array<i32>} : memref<8x11xf32, #tpu.memory_space<vmem>>, vector<8x11xf32>,
    return
  }
  func.func @transform_0(%arg0: i32) -> (i32, i32) {
    %c0_i32 = arith.constant 0 : i32
    %c0_i32_0 = arith.constant 0 : i32
    return %arg0, %c0_i32 : i32, i32
  }
  func.func @transform_1(%arg0: i32) -> (i32, i32) {
    %c0_i32 = arith.constant 0 : i32
    %c0_i32_0 = arith.constant 0 : i32
    %c0_i32_1 = arith.constant 0 : i32
    return %c0_i32, %c0_i32_0 : i32, i32
  }
  func.func @transform_2(%arg0: i32) -> (i32, i32) {
    %c0_i32 = arith.constant 0 : i32
    %c0_i32_0 = arith.constant 0 : i32
    %c0_i32_1 = arith.constant 0 : i32
    return %c0_i32, %c0_i32_0 : i32, i32
  }
  func.func @transform_3(%arg0: i32) -> (i32, i32) {
    %c0_i32 = arith.constant 0 : i32
    %c0_i32_0 = arith.constant 0 : i32
    %c0_i32_1 = arith.constant 0 : i32
    return %c0_i32, %c0_i32_0 : i32, i32
  }
  func.func @transform_4(%arg0: i32) -> (i32, i32) {
    %c0_i32 = arith.constant 0 : i32
    %c0_i32_0 = arith.constant 0 : i32
    %c0_i32_1 = arith.constant 0 : i32
    return %c0_i32, %c0_i32_0 : i32, i32
  }
  func.func @transform_5(%arg0: i32) -> (i32, i32) {
    %c0_i32 = arith.constant 0 : i32
    %c0_i32_0 = arith.constant 0 : i32
    return %arg0, %c0_i32 : i32, i32
  }
}

</mosaic_0001>

<bundles_post_ra>
// kernel: qnet_forward.1
= control target key start
LH: loop header
LB: loop body
LE: loop exit
PB: predicated region body
PF: predicated region fallthrough
CT: control target
= control target key end

     0   :  { %vm31_vm0 = vcmask 1042432   ;;  %vm27_vm1 = vcmask 23552   ;;  %s239_s0 = inlined_call_operand.vmem [shape: f32[8,3], index: 0, kind: input, shape index: {}]   ;;  %s240_s1 = inlined_call_operand.vmem [shape: f32[3,128], index: 1, kind: input, shape index: {}]   ;;  %s241_s2 = inlined_call_operand.vmem [shape: f32[1,128], index: 2, kind: input, shape index: {}]   ;;  %s242_s3 = inlined_call_operand.vmem [shape: f32[128,11], index: 3, kind: input, shape index: {}]   ;;  %s243_s4 = inlined_call_operand.vmem [shape: f32[1,11], index: 4, kind: input, shape index: {}]   ;;  %s244_s5 = inlined_call_operand.hbm [shape: f32[8,11], index: 5, kind: output, shape index: {}]  }
   0x1   :  { %v22_v0 = vld [vmem:[%s240_s1] sm:$0x7]  ;;  %v71_v2 = vld [vmem:[%s242_s3 + $0x78] sm:$0xff]  ;;  %v70_v3 = vld [vmem:[%s242_s3 + $0x70] sm:$0xff] }
   0x2   :  { %v21_v1 = vld [vmem:[%s239_s0] sm:$0xff]  ;;  %114 = vmatpush.msk.msra.mxu0 %vm31_vm0, %v22_v0  ;;  %76 = vmatpush.msra.mxu1 %v71_v2  ;;  %v69_v4 = vld [vmem:[%s242_s3 + $0x68] sm:$0xff]  ;;  %v67_v6 = vld [vmem:[%s242_s3 + $0x58] sm:$0xff] }
   0x3   :  { %115 = vmatmul.msk.f32.vlgmr.msra.gmra.mxu0 %vm27_vm1, %v21_v1  ;;  %v68_v5 = vld [vmem:[%s242_s3 + $0x60] sm:$0xff] }
   0x4   :  { %77 = vmatpush.msra.mxu1 %v70_v3 }
   0x6   :  { %78 = vmatpush.msra.mxu1 %v69_v4 }
   0x7   :  { %10 = vsyncpa [#allocation3], 0  ;;  %v66_v7 = vld [vmem:[%s242_s3 + $0x50] sm:$0xff]  ;;  %v65_v8 = vld [vmem:[%s242_s3 + $0x48] sm:$0xff]  ;;  %s145_s29 = smov [#allocation2]   ;;  %s105_s8 = sshll.u32 %s244_s5, 4  ;;  %s106_s8 = int_to_ptr.hbm [resolvable:$true] %s105_s8 }
   0x8   :  { %79 = vmatpush.msra.mxu1 %v68_v5  ;;  %v64_v9 = vld [vmem:[%s242_s3 + $0x40] sm:$0xff]  ;;  %v63_v10 = vld [vmem:[%s242_s3 + $0x38] sm:$0xff]  ;;  %v62_v11 = vld [vmem:[%s242_s3 + $0x30] sm:$0xff]  ;;  %s103_s30 = sshll.u32 %s145_s29, 4  ;;  %vm96_vm2 = vcmask 89088   ;;  %s104_s30 = int_to_ptr.vmem [resolvable:$true] %s103_s30 }
   0x9   :  { %v61_v12 = vld [vmem:[%s242_s3 + $0x28] sm:$0xff]  ;;  %v60_v13 = vld [vmem:[%s242_s3 + $0x20] sm:$0xff]  ;;  %v59_v14 = vld [vmem:[%s242_s3 + $0x18] sm:$0xff] }
   0xa   :  { %80 = vmatpush.msra.mxu1 %v67_v6  ;;  %v58_v15 = vld [vmem:[%s242_s3 + $0x10] sm:$0xff]  ;;  %v57_v16 = vld [vmem:[%s242_s3 + $0x8] sm:$0xff]  ;;  %v56_v17 = vld [vmem:[%s242_s3] sm:$0xff] }
   0xb   :  { %v117_v18 = vld [vmem:[%s241_s2] ss:$0 sm:$0xff] }
   0xc   :  { %81 = vmatpush.msra.mxu1 %v66_v7  ;;  %v118_v22 = vld [vmem:[%s243_s4] ss:$0 sm:$0xff] }
   0xe   :  { %82 = vmatpush.msra.mxu1 %v65_v8 }
  0x10   :  { %83 = vmatpush.msra.mxu1 %v64_v9 }
  0x12   :  { %84 = vmatpush.msra.mxu1 %v63_v10 }
  0x14   :  { %85 = vmatpush.msra.mxu1 %v62_v11 }
  0x16   :  { %86 = vmatpush.msra.mxu1 %v61_v12 }
  0x18   :  { %87 = vmatpush.msra.mxu1 %v60_v13 }
  0x1a   :  { %88 = vmatpush.msra.mxu1 %v59_v14 }
  0x1c   :  { %89 = vmatpush.msra.mxu1 %v58_v15 }
  0x1e   :  { %90 = vmatpush.msra.mxu1 %v57_v16 }
  0x20   :  { %91 = vmatpush.msra.mxu1 %v56_v17 }
  0x80   :  { %v52_v19 = vpop.f32.mrf.mxu0 }
  0x81   :  { %v53_v20 = vadd.f32 %v117_v18, %v52_v19 }
  0x83   :  { %v55_v21 = vmax.f32 %v53_v20, 0.0 }
  0x85   :  { %92 = vmatmul.f32.vlgmr.msra.gmra.mxu1 %v55_v21 }
 0x102   :  { %v93_v23 = vpop.f32.mrf.mxu1 }
 0x103   :  { %v94_v24 = vadd.f32 %v118_v22, %v93_v23 }
 0x105   :  { %97 = vst.msk [vmem:[#allocation2] sm:$0xff] %vm96_vm2, %v94_v24 }
 0x106   :  { %108 = dma.vmem_to_hbm [thread:$0]  %s104_s30, 128, %s106_s8, [#allocation3]  }
 0x107   :  { %143 = dma.done.wait [#allocation3], 128  }
 0x108   :  { %144 = vsyncadd [#allocation3], 4294967168 }
 0x109   :  { %113 = vsyncpa [#allocation3], 1 }

</bundles_post_ra>
